<compile_context>
chip_gen: v7x
topology: tpu7x:2x2x1
jax: 0.10.0
libtpu: 0.0.40
codegen_flags: <defaults>
</compile_context>

<pallas_src>
import jax
import jax.numpy as jnp
from jax.experimental import pallas as pl
from jax.experimental.pallas import tpu as pltpu


_SMALL_INPUT_ELEMS = 1024                 # below this, jnp.abs is strictly faster
_DEFAULT_BLOCK_BYTES = 4 * 1024 * 1024    # ~4 MiB/block: 2 bufs x (in+out) = 16 MiB resident
_VMEM_LIMIT_BYTES = 32 * 1024 * 1024      # explicit scoped-VMEM limit (safe on v5e/v6e/v7x)
_LANE_WIDTH_CANDIDATES = (4096, 2048, 1024, 512, 384, 256, 128)


def _abs_kernel(x_ref, o_ref):
    # Elementwise absolute value on the current VMEM tile (pure VPU op).
    o_ref[...] = jnp.abs(x_ref[...])


def _sublane(dtype) -> int:
    # Minimum sublane tile per dtype: 8 for 32-bit, 16 for 16-bit, 32 for 8-bit.
    return max(8, 32 // jnp.dtype(dtype).itemsize)


def _abs_2d(x2: jax.Array, block_budget_bytes: int) -> jax.Array:
    """Run the abs kernel on a 2D array with byte-budgeted (row, col) tiling."""
    rows, cols = x2.shape
    itemsize = jnp.dtype(x2.dtype).itemsize
    sublane = _sublane(x2.dtype)

    # Column tile: tile in multiples of 128 when legal, else take the full extent
    # (a block dim equal to the full array dim is always legal).
    if cols % 128 == 0:
        max_c = max(128, (block_budget_bytes // (sublane * itemsize)) // 128 * 128)
        tile_c = min(cols, max_c)
    else:
        tile_c = cols

    # Row tile: fill the remaining byte budget, aligned to the dtype's sublane.
    max_r = max(sublane, (block_budget_bytes // (tile_c * itemsize)) // sublane * sublane)
    tile_r = rows if max_r >= rows else max_r

    # If everything landed in a single block but there is enough work, split the
    # row axis so the 'parallel' grid can shard across both TensorCores (v7x).
    if tile_r == rows and tile_c == cols and rows >= 2 * sublane:
        half = pl.cdiv(rows, 2)
        tile_r = pl.cdiv(half, sublane) * sublane

    grid = (pl.cdiv(rows, tile_r), pl.cdiv(cols, tile_c))

    return pl.pallas_call(
        _abs_kernel,
        out_shape=jax.ShapeDtypeStruct((rows, cols), x2.dtype),
        grid_spec=pltpu.PrefetchScalarGridSpec(
            num_scalar_prefetch=0,
            grid=grid,
            in_specs=[pl.BlockSpec((tile_r, tile_c), lambda i, j: (i, j))],
            out_specs=pl.BlockSpec((tile_r, tile_c), lambda i, j: (i, j)),
        ),
        compiler_params=pltpu.CompilerParams(
            dimension_semantics=("parallel", "parallel"),
            vmem_limit_bytes=_VMEM_LIMIT_BYTES,
        ),
    )(x2)


def pallas_abs(x: jax.Array, *, block_budget_bytes: int = _DEFAULT_BLOCK_BYTES) -> jax.Array:
    """Elementwise |x| via a Pallas TPU kernel. Accepts any shape/dtype."""
    orig_shape = x.shape
    n = x.size

    # Fast path: tiny (or empty) inputs — kernel launch overhead dominates.
    if n < _SMALL_INPUT_ELEMS:
        return jnp.abs(x)

    itemsize = jnp.dtype(x.dtype).itemsize
    sublane = _sublane(x.dtype)

    # Abs is layout-agnostic: flatten and reshape to a lane-dense 2D slab
    # (last dim a large multiple of 128) whenever the element count allows it.
    # Prefer the widest lane dim that still leaves >= one full sublane of rows.
    x2 = None
    fallback_w = None
    for w in _LANE_WIDTH_CANDIDATES:
        if n % w == 0:
            if fallback_w is None:
                fallback_w = w
            if n // w >= sublane:
                x2 = x.reshape(n // w, w)
                break
    if x2 is None and fallback_w is not None:
        x2 = x.reshape(n // fallback_w, fallback_w)

    if x2 is None:
        # Total element count is not a multiple of 128: keep the trailing dim as
        # the lane axis and use a full-extent column block (legal for any width).
        last = orig_shape[-1] if x.ndim >= 1 else 1
        x2 = x.reshape(-1, last)
        rows, cols = x2.shape
        if sublane * cols * itemsize > block_budget_bytes:
            # Rare fallback: trailing dim is huge and not 128-divisible — pad the
            # lane axis once so it can be tiled, then slice the result back.
            pad_c = (-cols) % 128
            out = _abs_2d(jnp.pad(x2, ((0, 0), (0, pad_c))), block_budget_bytes)
            return out[:, :cols].reshape(orig_shape)

    out = _abs_2d(x2, block_budget_bytes)
    return out.reshape(orig_shape)


class Abs:
    """JAX/Pallas port of the PyTorch Abs module (no parameters)."""

    def __init__(self, in_dim, device=None):
        self.in_dim = in_dim
        self.out_dim = in_dim
        self.is_unary = True
        self.is_directed = True

    def __call__(self, x):
        return pallas_abs(x)


if __name__ == "__main__":
    key = jax.random.PRNGKey(0)
    k0, k1, k2, k3, k4 = jax.random.split(key, 5)

    # 1) Primary test: (2, 4, 16, 16) f32 — lane-dense reshape kernel path.
    x0 = jax.random.normal(k0, (2, 4, 16, 16), dtype=jnp.float32)
    mod = Abs(16)
    y0 = jax.block_until_ready(mod(x0))
    assert y0.shape == x0.shape and y0.dtype == x0.dtype
    assert jnp.allclose(y0, jnp.abs(x0))

    # 2) bf16 (dtype-aware sublane alignment).
    x1 = jax.random.normal(k1, (16, 256), dtype=jnp.bfloat16)
    y1 = jax.block_until_ready(pallas_abs(x1))
    assert y1.shape == x1.shape and y1.dtype == x1.dtype
    assert jnp.allclose(y1.astype(jnp.float32), jnp.abs(x1).astype(jnp.float32))

    # 3) Non-128-divisible shape with a tiny block budget — exercises the
    #    full-extent column block + ragged final row block (masked writes).
    x2 = jax.random.normal(k2, (100, 300), dtype=jnp.float32)
    y2 = jax.block_until_ready(pallas_abs(x2, block_budget_bytes=8 * 1024))
    assert jnp.allclose(y2, jnp.abs(x2))

    # 4) Wide lane-dense slab with a tiny block budget — exercises column tiling.
    x3 = jax.random.normal(k3, (64, 512), dtype=jnp.float32)
    y3 = jax.block_until_ready(pallas_abs(x3, block_budget_bytes=8 * 1024))
    assert jnp.allclose(y3, jnp.abs(x3))

    # 5) Tiny input — small-input fast path (no kernel launch).
    x4 = jax.random.normal(k4, (8, 32), dtype=jnp.float32)
    y4 = jax.block_until_ready(pallas_abs(x4))
    assert jnp.allclose(y4, jnp.abs(x4))

    print("KERNEL_OK")
</pallas_src>

<mosaic_0001>
module attributes {stable_mosaic.version = 11 : i64} {
  func.func @_abs_kernel(%arg0: i32, %arg1: i32, %arg2: memref<8x256xf32, #tpu.memory_space<vmem>>, %arg3: memref<8x256xf32, #tpu.memory_space<vmem>>) attributes {dimension_semantics = [#tpu.dimension_semantics<parallel>, #tpu.dimension_semantics<parallel>], iteration_bounds = array<i64: 1, 1>, scalar_prefetch = 0 : i64, scratch_operands = 0 : i64, tpu.core_type = #tpu.core_type<tc>, window_params = [{transform_indices = @transform_0, window_bounds = array<i64: 8, 256>}, {transform_indices = @transform_1, window_bounds = array<i64: 8, 256>}]} {
    %c0 = arith.constant 0 : index
    %c0_0 = arith.constant 0 : index
    %0 = vector.load %arg2[%c0, %c0_0] : memref<8x256xf32, #tpu.memory_space<vmem>>, vector<8x256xf32>
    %1 = math.absf %0 : vector<8x256xf32>
    %c0_1 = arith.constant 0 : index
    %c0_2 = arith.constant 0 : index
    %2 = vector.load %arg3[%c0_1, %c0_2] : memref<8x256xf32, #tpu.memory_space<vmem>>, vector<8x256xf32>
    tpu.vector_store %arg3[%c0_1, %c0_2], %1 {strides = array<i32>} : memref<8x256xf32, #tpu.memory_space<vmem>>, vector<8x256xf32>,
    return
  }
  func.func @transform_0(%arg0: i32, %arg1: i32) -> (i32, i32) {
    %c0_i32 = arith.constant 0 : i32
    return %arg0, %arg1 : i32, i32
  }
  func.func @transform_1(%arg0: i32, %arg1: i32) -> (i32, i32) {
    %c0_i32 = arith.constant 0 : i32
    return %arg0, %arg1 : i32, i32
  }
}

</mosaic_0001>

<bundles_post_ra>
// kernel: tpu_custom_call.1
= control target key start
LH: loop header
LB: loop body
LE: loop exit
PB: predicated region body
PF: predicated region fallthrough
CT: control target
= control target key end

     0   :  { %6 = vsyncpa [#allocation3], 0  ;;  %s128_s0 = inlined_call_operand.hbm [shape: f32[8,256], index: 0, kind: input, shape index: {}]   ;;  %s129_s1 = inlined_call_operand.hbm [shape: f32[8,256], index: 1, kind: output, shape index: {}]  }
   0x1   :  { %7 = vsyncpa [#allocation4], 0  ;;  %s92_s6 = smov [#allocation2]   ;;  %s44_s10 = scalar_lea.hbm %s128_s0, 256 }
   0x2   :  { %s14_s7 = sshll.u32 %s92_s6, 4  ;;  %p45_p0 = scmp.ne.s32.totalorder %s128_s0, %s44_s10  ;;  %s15_s7 = int_to_ptr.vmem [resolvable:$true] %s14_s7 }
   0x3   :  { %p48_p1 = scmp.lt.u32.totalorder %s44_s10, %s128_s0 }
   0x5   :  { %p50_p2 = pnand %p48_p1, %p45_p0 }
   0x7   :  { %53 = shalt.err (!%p50_p2)
}
   0x8   :  { %s54_s15 = scalar_lea.vmem %s15_s7, 256  ;;  %p59_p4 = scmp.lt.s32.totalorder %s15_s7, %s15_s7 }
   0x9   :  { %p55_p3 = scmp.ne.s32.totalorder %s15_s7, %s54_s15  ;;  %p60_p5 = scmp.lt.s32.totalorder %s54_s15, %s54_s15 }
   0xb   :  { %p61_p6 = por %p60_p5, %p59_p4 }
   0xd   :  { %p62_p7 = pnand %p61_p6, %p55_p3 }
   0xf   :  { %65 = shalt.err (!%p62_p7)
}
  0x10   :  { %17 = dma.hbm_to_vmem [thread:$0]  %s128_s0, 256, %s15_s7, [#allocation3]  }
  0x11   :  { %88 = dma.done.wait [#allocation3], 256  }
  0x12   :  { %89 = vsyncadd [#allocation3], 4294967040  ;;  %s93_s18 = smov [#allocation5]   ;;  %v21_v0 = vld [vmem:[#allocation2] sm:$0xff]  ;;  %v22_v1 = vld [vmem:[#allocation2 + $0x8] sm:$0xff] }
  0x13   :  { %s33_s19 = sshll.u32 %s93_s18, 4  ;;  %v23_v2 = vand.u32 2147483647, %v21_v0  ;;  %v24_v3 = vand.u32 2147483647, %v22_v1  ;;  %s34_s19 = int_to_ptr.vmem [resolvable:$true] %s33_s19 }
  0x14   :  { %s66_s20 = scalar_lea.vmem %s34_s19, 256  ;;  %p71_p9 = scmp.lt.s32.totalorder %s34_s19, %s34_s19 }
  0x15   :  { %25 = vst [vmem:[#allocation5] sm:$0xff] %v23_v2  ;;  %26 = vst [vmem:[#allocation5 + $0x8] sm:$0xff] %v24_v3  ;;  %p67_p8 = scmp.ne.s32.totalorder %s34_s19, %s66_s20  ;;  %p72_p10 = scmp.lt.s32.totalorder %s66_s20, %s66_s20 }
  0x17   :  { %p73_p11 = por %p72_p10, %p71_p9 }
  0x19   :  { %p74_p12 = pnand %p73_p11, %p67_p8 }
  0x1b   :  { %77 = shalt.err (!%p74_p12)
}
  0x1c   :  { %s78_s22 = scalar_lea.hbm %s129_s1, 256 }
  0x1d   :  { %p79_p13 = scmp.ne.s32.totalorder %s129_s1, %s78_s22  ;;  %p82_p0 = scmp.lt.u32.totalorder %s78_s22, %s129_s1 }
  0x1f   :  { %p84_p1 = pnand %p82_p0, %p79_p13 }
  0x21   :  { %87 = shalt.err (!%p84_p1)
}
  0x22   :  { %36 = dma.vmem_to_hbm [thread:$0]  %s34_s19, 256, %s129_s1, [#allocation4]  }
  0x23   :  { %90 = dma.done.wait [#allocation4], 256  }
  0x24   :  { %91 = vsyncadd [#allocation4], 4294967040 }
  0x25   :  { %40 = vsyncpa [#allocation3], 1 }
  0x26   :  { %41 = vsyncpa [#allocation4], 1 }

</bundles_post_ra>
